<compile_context>
chip_gen: v5e
topology: v5e:2x2
jax: 0.10.0
libtpu: 0.0.40
codegen_flags: <defaults>
</compile_context>

<pallas_src>
import math
import functools

import jax
import jax.numpy as jnp
from jax.experimental import pallas as pl
from jax.experimental.pallas import tpu as pltpu


def _recip(x):
    """Approx reciprocal on the EUP when available; exact divide otherwise."""
    if hasattr(pl, "reciprocal"):
        return pl.reciprocal(x, approx=True)
    return 1.0 / x


def _pick_block_b(B, T, row_target=256, row_cap=2048):
    """Pick a batch block size (divisor of B): enough rows to fill the MXU
    without blowing VMEM.  (On v7x prefer >=2 batch blocks when B allows it.)"""
    best = 1
    for cand in range(1, B + 1):
        if B % cand != 0 or cand * T > row_cap:
            continue
        best = cand
        if cand * T >= row_target:
            break
    return best


# ---------------------------------------------------------------------------
# Kernel 1: input projection + positional encoding (batch-blocked, bf16 MXU)
# ---------------------------------------------------------------------------

def in_proj_pe_kernel(x_ref, w_ref, pe_ref, o_ref):
    """o = motion @ W (+ b folded into pe).  x:(Bb,T,Din) w:(Din,E) pe:(T,E)."""
    Bb, T, Din = x_ref.shape
    E = w_ref.shape[1]
    x2 = x_ref[...].reshape(Bb * T, Din).astype(w_ref.dtype)      # bf16 rows
    y = jnp.dot(x2, w_ref[...], preferred_element_type=jnp.float32)
    y = y.reshape(Bb, T, E) + pe_ref[...][None]                   # pe already has +b
    o_ref[...] = y.astype(o_ref.dtype)


def input_proj_pe(motion, w_bf16, pe_plus_b, block_b):
    B, T, Din = motion.shape
    E = w_bf16.shape[1]
    nb = B // block_b
    return pl.pallas_call(
        in_proj_pe_kernel,
        grid=(nb,),
        in_specs=[
            pl.BlockSpec((block_b, T, Din), lambda i: (i, 0, 0)),
            pl.BlockSpec((Din, E), lambda i: (0, 0)),
            pl.BlockSpec((T, E), lambda i: (0, 0)),
        ],
        out_specs=pl.BlockSpec((block_b, T, E), lambda i: (i, 0, 0)),
        out_shape=jax.ShapeDtypeStruct((B, T, E), motion.dtype),
        compiler_params=pltpu.CompilerParams(dimension_semantics=("parallel",)),
    )(motion, w_bf16, pe_plus_b)


# ---------------------------------------------------------------------------
# Kernel 2: full transformer encoder stack in ONE pallas_call
#   grid = (batch_blocks, n_layers); activation held in VMEM scratch across
#   the layer axis; stacked per-layer weights streamed via BlockSpec.
# ---------------------------------------------------------------------------

def encoder_stack_kernel(len_ref, x_ref,
                         wqkv_ref, bqkv_ref, wout_ref, bout_ref,
                         ln1g_ref, ln1b_ref,
                         wff1_ref, bff1_ref, wff2_ref, bff2_ref,
                         ln2g_ref, ln2b_ref,
                         o_ref, xs_ref, *, num_heads, block_b, eps=1e-5):
    b = pl.program_id(0)
    l = pl.program_id(1)
    n_layers = pl.num_programs(1)

    @pl.when(l == 0)
    def _():                                   # load activation once per batch block
        xs_ref[...] = x_ref[...].astype(jnp.float32)

    Bb, T, E = xs_ref.shape
    H = num_heads
    Dh = E // H
    rows = Bb * T
    scale = 1.0 / math.sqrt(Dh)

    x = xs_ref[...]                            # (Bb, T, E) f32
    x2 = x.reshape(rows, E)                    # flatten rows: layout-free

    # Key-padding bias built in-kernel from scalar-prefetched lengths.
    k_idx = jax.lax.broadcasted_iota(jnp.int32, (1, T), 1)
    bias = jnp.stack(
        [jnp.where(k_idx < len_ref[b * block_b + bi], 0.0, -1e9)
         for bi in range(block_b)], axis=0)    # (Bb, 1, T) f32

    # --- self-attention: QKV projection over all Bb*T rows (bf16 MXU) ---
    wqkv = wqkv_ref[0]                         # (E, 3E) bf16
    qkv = jnp.dot(x2.astype(wqkv.dtype), wqkv,
                  preferred_element_type=jnp.float32) + bqkv_ref[0]
    qkv3 = qkv.reshape(Bb, T, 3 * E).astype(jnp.bfloat16)

    wout = wout_ref[0]                         # (E, E) bf16
    acc = jnp.zeros((rows, E), jnp.float32)
    for h in range(H):                         # H static & small
        qh = qkv3[:, :, h * Dh:(h + 1) * Dh]
        kh = qkv3[:, :, E + h * Dh:E + (h + 1) * Dh]
        vh = qkv3[:, :, 2 * E + h * Dh:2 * E + (h + 1) * Dh]
        s = jnp.einsum("btd,bsd->bts", qh, kh,
                       preferred_element_type=jnp.float32) * scale
        s = s + bias
        s = s - jnp.max(s, axis=-1, keepdims=True)
        p = jnp.exp(s)
        p = p * _recip(jnp.sum(p, axis=-1, keepdims=True))
        ctx = jnp.einsum("bts,bsd->btd", p.astype(jnp.bfloat16), vh,
                         preferred_element_type=jnp.float32)      # (Bb, T, Dh)
        # Per-head partial out-projection accumulation (no head concat).
        acc = acc + jnp.dot(ctx.reshape(rows, Dh).astype(wout.dtype),
                            wout[h * Dh:(h + 1) * Dh, :],
                            preferred_element_type=jnp.float32)
    a = acc + bout_ref[0]

    # --- residual + LayerNorm 1 (f32) ---
    z = x2 + a
    mean = jnp.mean(z, axis=-1, keepdims=True)
    var = jnp.mean((z - mean) ** 2, axis=-1, keepdims=True)
    z = (z - mean) * jax.lax.rsqrt(var + eps) * ln1g_ref[0] + ln1b_ref[0]

    # --- feed-forward (bf16 matmuls, f32 accumulate, ReLU) ---
    wff1 = wff1_ref[0]
    wff2 = wff2_ref[0]
    hdn = jnp.dot(z.astype(wff1.dtype), wff1, preferred_element_type=jnp.float32)
    hdn = jnp.maximum(hdn + bff1_ref[0], 0.0)
    f = jnp.dot(hdn.astype(wff2.dtype), wff2, preferred_element_type=jnp.float32)
    f = f + bff2_ref[0]

    # --- residual + LayerNorm 2 (f32) ---
    z2 = z + f
    mean = jnp.mean(z2, axis=-1, keepdims=True)
    var = jnp.mean((z2 - mean) ** 2, axis=-1, keepdims=True)
    out = (z2 - mean) * jax.lax.rsqrt(var + eps) * ln2g_ref[0] + ln2b_ref[0]

    xs_ref[...] = out.reshape(Bb, T, E)

    @pl.when(l == n_layers - 1)
    def _():
        o_ref[...] = xs_ref[...].astype(o_ref.dtype)


def encoder_stack(x, lengths, sw, num_heads, block_b):
    B, T, E = x.shape
    Lyr = sw["w_qkv"].shape[0]
    F = sw["w_ff1"].shape[2]
    nb = B // block_b

    def wmap(b, l, lens):   # stacked per-layer weights: advance along layer axis
        return (l, 0, 0)

    def xmap(b, l, lens):   # activations: constant across the layer axis
        return (b, 0, 0)

    grid_spec = pltpu.PrefetchScalarGridSpec(
        num_scalar_prefetch=1,
        grid=(nb, Lyr),
        in_specs=[
            pl.BlockSpec((block_b, T, E), xmap),
            pl.BlockSpec((1, E, 3 * E), wmap),
            pl.BlockSpec((1, 1, 3 * E), wmap),
            pl.BlockSpec((1, E, E), wmap),
            pl.BlockSpec((1, 1, E), wmap),
            pl.BlockSpec((1, 1, E), wmap),
            pl.BlockSpec((1, 1, E), wmap),
            pl.BlockSpec((1, E, F), wmap),
            pl.BlockSpec((1, 1, F), wmap),
            pl.BlockSpec((1, F, E), wmap),
            pl.BlockSpec((1, 1, E), wmap),
            pl.BlockSpec((1, 1, E), wmap),
            pl.BlockSpec((1, 1, E), wmap),
        ],
        out_specs=pl.BlockSpec((block_b, T, E), xmap),
        scratch_shapes=[pltpu.VMEM((block_b, T, E), jnp.float32)],
    )
    return pl.pallas_call(
        functools.partial(encoder_stack_kernel, num_heads=num_heads,
                          block_b=block_b),
        grid_spec=grid_spec,
        out_shape=jax.ShapeDtypeStruct((B, T, E), x.dtype),
        compiler_params=pltpu.CompilerParams(
            dimension_semantics=("parallel", "arbitrary"),
            vmem_limit_bytes=48 * 1024 * 1024),
    )(lengths, x,
      sw["w_qkv"], sw["b_qkv"], sw["w_out"], sw["b_out"],
      sw["ln1_g"], sw["ln1_b"],
      sw["w_ff1"], sw["b_ff1"], sw["w_ff2"], sw["b_ff2"],
      sw["ln2_g"], sw["ln2_b"])


# ---------------------------------------------------------------------------
# Kernel 3: masked mean pooling + final fc (batch-blocked, one matmul / block)
# ---------------------------------------------------------------------------

def pool_fc_kernel(len_ref, x_ref, w_ref, b_ref, o_ref, *, block_b):
    blk = pl.program_id(0)
    x = x_ref[...].astype(jnp.float32)                       # (Bb, T, E)
    Bb, T, E = x.shape
    t_idx = jax.lax.broadcasted_iota(jnp.int32, (T, 1), 0)
    rows = []
    for bi in range(block_b):
        L = len_ref[blk * block_b + bi]
        m = (t_idx < L).astype(jnp.float32)                  # (T, 1)
        s = jnp.sum(x[bi] * m, axis=0, keepdims=True)        # (1, E)
        inv = jnp.where(L > 0,
                        1.0 / jnp.maximum(L, 1).astype(jnp.float32), 0.0)
        rows.append(s * inv)
    pooled = jnp.concatenate(rows, axis=0)                   # (Bb, E)
    y = jnp.dot(pooled.astype(w_ref.dtype), w_ref[...],
                preferred_element_type=jnp.float32) + b_ref[...]
    o_ref[...] = y.astype(o_ref.dtype)


def masked_pool_fc(x, lengths, fc_w_bf16, fc_b, block_b):
    B, T, E = x.shape
    nb = B // block_b
    return pl.pallas_call(
        functools.partial(pool_fc_kernel, block_b=block_b),
        grid_spec=pltpu.PrefetchScalarGridSpec(
            num_scalar_prefetch=1,
            grid=(nb,),
            in_specs=[
                pl.BlockSpec((block_b, T, E), lambda b, lens: (b, 0, 0)),
                pl.BlockSpec((E, E), lambda b, lens: (0, 0)),
                pl.BlockSpec((1, E), lambda b, lens: (0, 0)),
            ],
            out_specs=pl.BlockSpec((block_b, E), lambda b, lens: (b, 0)),
        ),
        out_shape=jax.ShapeDtypeStruct((B, E), x.dtype),
        compiler_params=pltpu.CompilerParams(dimension_semantics=("parallel",)),
    )(lengths, x, fc_w_bf16, fc_b.reshape(1, E))


# ---------------------------------------------------------------------------
# Model wiring
# ---------------------------------------------------------------------------

def make_pe(max_len, d_model):
    position = jnp.arange(max_len, dtype=jnp.float32)[:, None]
    div_term = jnp.exp(jnp.arange(0, d_model, 2, dtype=jnp.float32)
                       * (-math.log(10000.0) / d_model))
    ang = position * div_term
    pe = jnp.zeros((max_len, d_model), jnp.float32)
    pe = pe.at[:, 0::2].set(jnp.sin(ang))
    pe = pe.at[:, 1::2].set(jnp.cos(ang))
    return pe


def init_params(key, d_in, E, H, n_layers, F, max_len):
    keys = jax.random.split(key, 4 + n_layers)

    def w(k, shape, scale=0.05):
        return scale * jax.random.normal(k, shape, jnp.float32)

    params = {
        "num_heads": H,
        "proj_w": w(keys[0], (d_in, E)),
        "proj_b": jnp.zeros((E,), jnp.float32),
        "fc_w": w(keys[1], (E, E)),
        "fc_b": jnp.zeros((E,), jnp.float32),
        "pe": make_pe(max_len, E),
        "layers": [],
    }
    for i in range(n_layers):
        lk = jax.random.split(keys[4 + i], 4)
        params["layers"].append({
            "w_qkv": w(lk[0], (E, 3 * E)),
            "b_qkv": jnp.zeros((3 * E,), jnp.float32),
            "w_out": w(lk[1], (E, E)),
            "b_out": jnp.zeros((E,), jnp.float32),
            "ln1_g": jnp.ones((E,), jnp.float32),
            "ln1_b": jnp.zeros((E,), jnp.float32),
            "ln2_g": jnp.ones((E,), jnp.float32),
            "ln2_b": jnp.zeros((E,), jnp.float32),
            "w_ff1": w(lk[2], (E, F)),
            "b_ff1": 0.01 * jnp.ones((F,), jnp.float32),
            "w_ff2": w(lk[3], (F, E)),
            "b_ff2": jnp.zeros((E,), jnp.float32),
        })
    return params


def _stack_layer_params(layers):
    """Stack per-layer weights along a leading layer axis; bf16 matmul weights,
    f32 biases / LN params reshaped (L,1,X) so block last-two dims stay full."""
    st = lambda k: jnp.stack([lp[k] for lp in layers], axis=0)
    return {
        "w_qkv": st("w_qkv").astype(jnp.bfloat16),
        "b_qkv": st("b_qkv")[:, None, :],
        "w_out": st("w_out").astype(jnp.bfloat16),
        "b_out": st("b_out")[:, None, :],
        "ln1_g": st("ln1_g")[:, None, :],
        "ln1_b": st("ln1_b")[:, None, :],
        "w_ff1": st("w_ff1").astype(jnp.bfloat16),
        "b_ff1": st("b_ff1")[:, None, :],
        "w_ff2": st("w_ff2").astype(jnp.bfloat16),
        "b_ff2": st("b_ff2")[:, None, :],
        "ln2_g": st("ln2_g")[:, None, :],
        "ln2_b": st("ln2_b")[:, None, :],
    }


def motion_encoder_forward(params, motion, lengths):
    """motion: (B, T, D_in) float32; lengths: (B,) int32 -> (B, E)."""
    B, T, _ = motion.shape
    H = params["num_heads"]
    block_b = _pick_block_b(B, T)

    # host-side prep: bf16 matmul weights, proj bias folded into PE table.
    proj_w_bf16 = params["proj_w"].astype(jnp.bfloat16)
    pe_plus_b = (params["pe"][:T] + params["proj_b"][None, :]).astype(jnp.float32)
    fc_w_bf16 = params["fc_w"].astype(jnp.bfloat16)
    sw = _stack_layer_params(params["layers"])

    # TODO(synk): dropout layers are identity (eval mode); no RNG dropout applied.
    x = input_proj_pe(motion, proj_w_bf16, pe_plus_b, block_b)
    x = encoder_stack(x, lengths, sw, H, block_b)
    return masked_pool_fc(x, lengths, fc_w_bf16, params["fc_b"], block_b)


# ---------------------------------------------------------------------------
# Pure-JAX reference (for correctness check)
# ---------------------------------------------------------------------------

def _ref_layernorm(z, g, b, eps=1e-5):
    mean = jnp.mean(z, axis=-1, keepdims=True)
    var = jnp.mean((z - mean) ** 2, axis=-1, keepdims=True)
    return (z - mean) * jax.lax.rsqrt(var + eps) * g + b


def ref_forward(params, motion, lengths):
    hp = jax.lax.Precision.HIGHEST
    B, T, _ = motion.shape
    E = params["proj_w"].shape[1]
    H = params["num_heads"]
    Dh = E // H

    x = jnp.einsum("btd,de->bte", motion, params["proj_w"], precision=hp) + params["proj_b"]
    x = x + params["pe"][:T][None, :, :]
    key_valid = jnp.arange(T)[None, :] < lengths[:, None]
    key_bias = jnp.where(key_valid, 0.0, -1e9)

    for L in params["layers"]:
        qkv = jnp.einsum("bte,ef->btf", x, L["w_qkv"], precision=hp) + L["b_qkv"]
        q, k, v = jnp.split(qkv, 3, axis=-1)
        q = q.reshape(B, T, H, Dh).transpose(0, 2, 1, 3)
        k = k.reshape(B, T, H, Dh).transpose(0, 2, 1, 3)
        v = v.reshape(B, T, H, Dh).transpose(0, 2, 1, 3)
        s = jnp.einsum("bhtd,bhsd->bhts", q, k, precision=hp) / math.sqrt(Dh)
        s = s + key_bias[:, None, None, :]
        p = jax.nn.softmax(s, axis=-1)
        a = jnp.einsum("bhts,bhsd->bhtd", p, v, precision=hp)
        a = a.transpose(0, 2, 1, 3).reshape(B, T, E)
        a = jnp.einsum("bte,ef->btf", a, L["w_out"], precision=hp) + L["b_out"]
        x = _ref_layernorm(x + a, L["ln1_g"], L["ln1_b"])
        h = jnp.maximum(jnp.einsum("bte,ef->btf", x, L["w_ff1"], precision=hp) + L["b_ff1"], 0.0)
        h = jnp.einsum("btf,fe->bte", h, L["w_ff2"], precision=hp) + L["b_ff2"]
        x = _ref_layernorm(x + h, L["ln2_g"], L["ln2_b"])

    mask = key_valid.astype(jnp.float32)
    s = jnp.sum(x * mask[:, :, None], axis=1)
    denom = jnp.maximum(lengths, 1).astype(jnp.float32)[:, None]
    pooled = jnp.where((lengths > 0)[:, None], s / denom, 0.0)
    return jnp.einsum("be,ef->bf", pooled, params["fc_w"], precision=hp) + params["fc_b"]


# ---------------------------------------------------------------------------
# Main
# ---------------------------------------------------------------------------

if __name__ == "__main__":
    # Small shapes consistent with the module's forward:
    B, T, D_in = 2, 8, 16
    E, H, N_LAYERS, FFN = 32, 4, 2, 64
    MAX_LEN = 16

    key = jax.random.PRNGKey(0)
    k_motion, k_params = jax.random.split(key)
    motion = jax.random.normal(k_motion, (B, T, D_in), jnp.float32)
    lengths = jnp.array([T, 5], dtype=jnp.int32)   # second sequence is padded

    params = init_params(k_params, D_in, E, H, N_LAYERS, FFN, MAX_LEN)

    out = motion_encoder_forward(params, motion, lengths)
    out = jax.block_until_ready(out)

    assert out.shape == (B, E), out.shape
    ref = ref_forward(params, motion, lengths)
    # Tolerance widened slightly vs the pure-f32 version: matmul operands are
    # bf16 (f32 accumulation) and the softmax denominator uses approx reciprocal.
    assert jnp.allclose(out, ref, rtol=3e-2, atol=3e-2), \
        f"max abs err {jnp.max(jnp.abs(out - ref))}"

    print("KERNEL_OK")
</pallas_src>

<mosaic_0001>
module attributes {stable_mosaic.version = 11 : i64} {
  func.func @in_proj_pe_kernel(%arg0: i32, %arg1: memref<2x8x16xf32, #tpu.memory_space<vmem>>, %arg2: memref<16x32xbf16, #tpu.memory_space<vmem>>, %arg3: memref<8x32xf32, #tpu.memory_space<vmem>>, %arg4: memref<2x8x32xf32, #tpu.memory_space<vmem>>) attributes {dimension_semantics = [#tpu.dimension_semantics<parallel>], iteration_bounds = array<i64: 1>, scalar_prefetch = 0 : i64, scratch_operands = 0 : i64, tpu.core_type = #tpu.core_type<tc>, window_params = [{transform_indices = @transform_0, window_bounds = array<i64: 2, 8, 16>}, {pipeline_mode = #tpu.pipeline_mode<synchronous>, transform_indices = @transform_1, window_bounds = array<i64: 16, 32>}, {pipeline_mode = #tpu.pipeline_mode<synchronous>, transform_indices = @transform_2, window_bounds = array<i64: 8, 32>}, {transform_indices = @transform_3, window_bounds = array<i64: 2, 8, 32>}]} {
    %c0 = arith.constant 0 : index
    %c0_0 = arith.constant 0 : index
    %c0_1 = arith.constant 0 : index
    %0 = vector.load %arg1[%c0, %c0_0, %c0_1] : memref<2x8x16xf32, #tpu.memory_space<vmem>>, vector<2x8x16xf32>
    %1 = vector.shape_cast %0 : vector<2x8x16xf32> to vector<16x16xf32>
    %2 = arith.truncf %1 : vector<16x16xf32> to vector<16x16xbf16>
    %c0_2 = arith.constant 0 : index
    %c0_3 = arith.constant 0 : index
    %3 = vector.load %arg2[%c0_2, %c0_3] : memref<16x32xbf16, #tpu.memory_space<vmem>>, vector<16x32xbf16>
    %cst = arith.constant dense<0.000000e+00> : vector<16x32xf32>
    %4 = tpu.matmul %2, %3, %cst {dimension_numbers = #tpu.dot_dimension_numbers<[1], [0], [0], [1], [0, 0, 1, 1], [], []>} : vector<16x16xbf16>, vector<16x32xbf16>, vector<16x32xf32> -> vector<16x32xf32>
    %5 = vector.shape_cast %4 : vector<16x32xf32> to vector<2x8x32xf32>
    %c0_4 = arith.constant 0 : index
    %c0_5 = arith.constant 0 : index
    %6 = vector.load %arg3[%c0_4, %c0_5] : memref<8x32xf32, #tpu.memory_space<vmem>>, vector<8x32xf32>
    %7 = vector.shape_cast %6 : vector<8x32xf32> to vector<1x8x32xf32>
    %8 = vector.broadcast %7 : vector<1x8x32xf32> to vector<2x8x32xf32>
    %9 = arith.addf %5, %8 : vector<2x8x32xf32>
    %c0_6 = arith.constant 0 : index
    %c0_7 = arith.constant 0 : index
    %c0_8 = arith.constant 0 : index
    %10 = vector.load %arg4[%c0_6, %c0_7, %c0_8] : memref<2x8x32xf32, #tpu.memory_space<vmem>>, vector<2x8x32xf32>
    tpu.vector_store %arg4[%c0_6, %c0_7, %c0_8], %9 {strides = array<i32>} : memref<2x8x32xf32, #tpu.memory_space<vmem>>, vector<2x8x32xf32>,
    return
  }
  func.func @transform_0(%arg0: i32) -> (i32, i32, i32) {
    %c0_i32 = arith.constant 0 : i32
    %c0_i32_0 = arith.constant 0 : i32
    %c0_i32_1 = arith.constant 0 : i32
    return %arg0, %c0_i32, %c0_i32_0 : i32, i32, i32
  }
  func.func @transform_1(%arg0: i32) -> (i32, i32) {
    %c0_i32 = arith.constant 0 : i32
    %c0_i32_0 = arith.constant 0 : i32
    %c0_i32_1 = arith.constant 0 : i32
    return %c0_i32, %c0_i32_0 : i32, i32
  }
  func.func @transform_2(%arg0: i32) -> (i32, i32) {
    %c0_i32 = arith.constant 0 : i32
    %c0_i32_0 = arith.constant 0 : i32
    %c0_i32_1 = arith.constant 0 : i32
    return %c0_i32, %c0_i32_0 : i32, i32
  }
  func.func @transform_3(%arg0: i32) -> (i32, i32, i32) {
    %c0_i32 = arith.constant 0 : i32
    %c0_i32_0 = arith.constant 0 : i32
    %c0_i32_1 = arith.constant 0 : i32
    return %arg0, %c0_i32, %c0_i32_0 : i32, i32, i32
  }
}

</mosaic_0001>

<bundles_post_ra>
// kernel: tpu_custom_call.1
= control target key start
LH: loop header
LB: loop body
LE: loop exit
PB: predicated region body
PF: predicated region fallthrough
CT: control target
= control target key end

     0   :  { %8 = vsyncpa [#allocation3], 0  ;;  %s278_s0 = inlined_call_operand.hbm [shape: f32[2,8,16], index: 0, kind: input, shape index: {}]   ;;  %s279_s1 = inlined_call_operand.hbm [shape: bf16[16,32], index: 1, kind: input, shape index: {}]   ;;  %s280_s2 = inlined_call_operand.hbm [shape: f32[8,32], index: 2, kind: input, shape index: {}]   ;;  %s281_s3 = inlined_call_operand.hbm [shape: f32[2,8,32], index: 3, kind: output, shape index: {}]  }
   0x1   :  { %9 = vsyncpa [#allocation6], 0  ;;  %s28_s14 = sshll.u32 %s279_s1, 4  ;;  %s29_s14 = int_to_ptr.hbm [resolvable:$true] %s28_s14 }
   0x2   :  { %10 = vsyncpa [#allocation4], 0  ;;  %s232_s15 = smov [#allocation5]   ;;  %s15_s19 = sshll.u32 %s278_s0, 4  ;;  %s16_s19 = int_to_ptr.hbm [resolvable:$true] %s15_s19 }
   0x3   :  { %s30_s16 = sshll.u32 %s232_s15, 4  ;;  %s233_s20 = smov 64   ;;  %s31_s16 = int_to_ptr.vmem [resolvable:$true] %s30_s16 }
   0x4   :  { %s234_s21 = smov 4   ;;  %s235_s22 = smov [#allocation2]  }
   0x5   :  { %36 = dma.hbm_to_vmem [thread:$0]  %s29_s14, 128, %s31_s16, [#allocation6], %s233_s20, %s233_s20, %s234_s21  }
   0x6   :  { %s17_s23 = sshll.u32 %s235_s22, 4  ;;  %s236_s24 = smov 128   ;;  %s18_s23 = int_to_ptr.vmem [resolvable:$true] %s17_s23 }
   0x7   :  { %s237_s25 = smov 8   ;;  %s42_s27 = sshll.u32 %s280_s2, 4  ;;  %s43_s27 = int_to_ptr.hbm [resolvable:$true] %s42_s27 }
   0x8   :  { %23 = dma.hbm_to_vmem [thread:$0]  %s16_s19, 256, %s18_s23, [#allocation3], %s236_s24, %s236_s24, %s237_s25  }
   0x9   :  { %s238_s28 = smov [#allocation7]  }
   0xa   :  { %s44_s0 = sshll.u32 %s238_s28, 4  ;;  %s45_s0 = int_to_ptr.vmem [resolvable:$true] %s44_s0 }
   0xb   :  { %47 = dma.hbm_to_vmem [thread:$0]  %s43_s27, 128, %s45_s0, [#allocation6]  }
   0xc   :  { %226 = dma.done.wait [#allocation3], 256  }
   0xd   :  { %227 = vsyncadd [#allocation3], 4294967040 }
   0xe   :  { %228 = dma.done.wait [#allocation6], 256  }
   0xf   :  { %229 = vsyncadd [#allocation6], 4294967040  ;;  %v121_v0 = vld [vmem:[#allocation5] sm:$0xff]  ;;  %v61_v1 = vld [vmem:[#allocation2] sm:$0xff]  ;;  %vm72_vm0 = vcmask 130048   ;;  %vm93_vm1 = vcmask 261120  }
  0x10   :  { %v62_v2 = vld [vmem:[#allocation2 + $0x8] sm:$0xff]  ;;  %83 = vmatpush.bf16.msra.mxu0 %v121_v0  ;;  %v90_v4 = vld [vmem:[#allocation7] sm:$0xff]  ;;  %s239_s2 = smov [#allocation8]   ;;  %s102_s5 = sshll.u32 %s281_s3, 4  ;;  %s103_s5 = int_to_ptr.hbm [resolvable:$true] %s102_s5 }
  0x11   :  { %v63_v3 = vpack.c.bf16 %v62_v2, %v61_v1  ;;  %s100_s29 = sshll.u32 %s239_s2, 4  ;;  %s101_s29 = int_to_ptr.vmem [resolvable:$true] %s100_s29 }
  0x13   :  { %120 = vmatmul.msk.bf16.vlgmr.msra.gmra.mxu0 %vm72_vm0, %v63_v3 }
  0x90   :  { %v85_v5 = vpop.f32.mrf.mxu0 }
  0x91   :  { %v91_v6 = vadd.f32 %v90_v4, %v85_v5 }
  0x93   :  { %94 = vst.msk [vmem:[#allocation8] sm:$0xff] %vm93_vm1, %v91_v6 }
  0x98   :  { %v87_v7 = vpop.f32.mrf.mxu0 }
  0x99   :  { %v92_v8 = vadd.f32 %v90_v4, %v87_v7 }
  0x9b   :  { %95 = vst.msk [vmem:[#allocation8 + $0x8] sm:$0xff] %vm93_vm1, %v92_v8 }
  0x9c   :  { %108 = dma.vmem_to_hbm [thread:$0]  %s101_s29, 256, %s103_s5, [#allocation4], %s236_s24, %s236_s24, %s237_s25  }
  0x9d   :  { %230 = dma.done.wait [#allocation4], 256  }
  0x9e   :  { %231 = vsyncadd [#allocation4], 4294967040 }
  0x9f   :  { %113 = vsyncpa [#allocation3], 1 }
  0xa0   :  { %114 = vsyncpa [#allocation6], 1 }
  0xa1   :  { %115 = vsyncpa [#allocation4], 1 }

</bundles_post_ra>
